<compile_context>
chip_gen: v7x
topology: tpu7x:2x2x1
jax: 0.10.0
libtpu: 0.0.40
codegen_flags: <defaults>
</compile_context>

<pallas_src>
import jax
import jax.numpy as jnp
import numpy as np
from jax.experimental import pallas as pl
from jax.experimental.pallas import tpu as pltpu


def _round_up(n, m):
    return ((n + m - 1) // m) * m


def _vmem_limit_bytes():
    """Per-generation scoped VMEM limit (physical: 128 MiB v5e/v6e, 64 MiB v7x)."""
    cap = 64 * 1024 * 1024  # conservative default == v7x per-TC physical VMEM
    try:
        info = pltpu.get_tpu_info()
        cap = int(getattr(info, "vmem_capacity_bytes", cap) or cap)
    except Exception:
        pass
    # Leave headroom for compiler-internal scratch; never request more than ~100MB.
    return min(int(cap * 3 // 4), 100 * 1024 * 1024)


def _pick_row_tile(H, W, B, requested, per_step_bytes, budget, sub_align):
    divs = [d for d in range(1, H + 1) if H % d == 0]

    def legal(th):      # hard (8,128) rule on the (th*W, C_in) activation block
        return th == H or (th * W) % 8 == 0

    def aligned(th):    # perf: full sublane packing (16 rows for 16-bit data)
        return th == H or (th * W) % sub_align == 0

    fits = [d for d in divs if legal(d) and per_step_bytes(d) <= budget]
    if not fits:        # degrade gracefully rather than jumping to th = H
        fits = [d for d in divs if legal(d)] or [divs[0]]
    cands = [d for d in fits if aligned(d)] or fits

    if requested is not None:
        below = [d for d in cands if d <= requested]
        return max(below) if below else min(cands)

    # Auto: largest fitting tile that still leaves >= 2 parallel grid steps
    # (megacore / v7x two-TensorCore sharding).  If impossible, take the max.
    for th in sorted(cands, reverse=True):
        if B * (H // th) >= 2:
            return th
    return max(cands)


def upsample_pallas(x, weight, bias, input_resolution, *, row_tile=None,
                    compute_dtype=None, out_dtype=None):
    """x: (B, H*W, C_in); weight: (C_in, C_out, 2, 2) [torch ConvTranspose2d layout];
    bias: (C_out,). Returns (B, 4*H*W, C_out) matching the PyTorch module."""
    H, W = input_resolution
    B, L, C_in = x.shape
    assert L == H * W, (L, H, W)
    C_in_w, C_out, KH, KW = weight.shape
    assert (C_in_w, KH, KW) == (C_in, 2, 2), weight.shape

    if out_dtype is None:
        out_dtype = x.dtype
    # bf16 MXU inputs (f32 accumulation) by default for the large-channel stages;
    # the small stages are DMA-bound either way.
    if compute_dtype is None and C_in >= 256:
        compute_dtype = jnp.bfloat16
    mm_dtype = jnp.dtype(compute_dtype) if compute_dtype is not None else jnp.dtype(x.dtype)

    # Fused RHS only when the ki split point (2*C_out lanes) lies on a 128-lane
    # vreg boundary; otherwise one matmul per ki stored directly (no lane slice).
    fused = (2 * C_out) % 128 == 0

    x_itemsize = jnp.dtype(x.dtype).itemsize
    o_itemsize = jnp.dtype(out_dtype).itemsize
    w_itemsize = mm_dtype.itemsize

    def per_step_bytes(th):
        xb = _round_up(th * W, 8) * _round_up(C_in, 128) * x_itemsize
        ob = th * 2 * _round_up(W, 8) * _round_up(2 * C_out, 128) * o_itemsize
        if fused:
            wb = _round_up(C_in, 8) * _round_up(4 * C_out, 128) * w_itemsize
            bb = 8 * _round_up(4 * C_out, 128) * 4
        else:
            wb = 2 * _round_up(C_in, 8) * _round_up(2 * C_out, 128) * w_itemsize
            bb = 8 * _round_up(2 * C_out, 128) * 4
        # every block (incl. the constant-index weight) is allocated double-buffered
        return 2 * (xb + ob + wb + bb)

    vmem_limit = _vmem_limit_bytes()
    budget = int(vmem_limit * 0.6)
    sub_align = 16 if (mm_dtype.itemsize == 2 or o_itemsize == 2) else 8
    th = _pick_row_tile(H, W, B, row_tile, per_step_bytes, budget, sub_align)
    n_tiles = H // th

    bias_f32 = bias.reshape(1, C_out).astype(jnp.float32)
    if fused:
        # (C_in, C_out, 2, 2) -> (C_in, 2, 2, C_out) -> (C_in, 4*C_out); cols = (ki, kj, co)
        w_mm = jnp.transpose(weight, (0, 2, 3, 1)).reshape(C_in, 4 * C_out).astype(mm_dtype)
        b_all = jnp.tile(bias_f32, (1, 4))                      # (1, 4*C_out)
        w_spec = pl.BlockSpec((C_in, 4 * C_out), lambda b, t: (0, 0))
        b_spec = pl.BlockSpec((1, 4 * C_out), lambda b, t: (0, 0))
    else:
        # (C_in, C_out, 2, 2) -> (2, C_in, 2, C_out) -> (2, C_in, 2*C_out); cols = (kj, co)
        w_mm = jnp.transpose(weight, (2, 0, 3, 1)).reshape(2, C_in, 2 * C_out).astype(mm_dtype)
        b_all = jnp.tile(bias_f32, (1, 2))                      # (1, 2*C_out)
        w_spec = pl.BlockSpec((2, C_in, 2 * C_out), lambda b, t: (0, 0, 0))
        b_spec = pl.BlockSpec((1, 2 * C_out), lambda b, t: (0, 0))

    def kernel(x_ref, w_ref, b_ref, o_ref):
        # x_ref: (1, th*W, C_in)  raw activations; cast to MXU dtype in-register
        # o_ref: (1, th, 2, W, 2*C_out) -- row-major == final token order
        xm = x_ref[0].astype(mm_dtype)
        if fused:
            y = jnp.dot(xm, w_ref[...], preferred_element_type=jnp.float32)
            y = (y + b_ref[...]).reshape(th, W, 4 * C_out)
            # split point is a multiple of 128 lanes: whole-vreg-tile selection
            o_ref[0, :, 0, :, :] = y[:, :, : 2 * C_out].astype(o_ref.dtype)   # ki = 0
            o_ref[0, :, 1, :, :] = y[:, :, 2 * C_out:].astype(o_ref.dtype)    # ki = 1
        else:
            for ki in range(2):  # unrolled at trace time
                y = jnp.dot(xm, w_ref[ki], preferred_element_type=jnp.float32)
                y = (y + b_ref[...]).reshape(th, W, 2 * C_out)
                o_ref[0, :, ki, :, :] = y.astype(o_ref.dtype)

    grid_spec = pltpu.PrefetchScalarGridSpec(
        num_scalar_prefetch=0,
        grid=(B, n_tiles),
        in_specs=[
            pl.BlockSpec((1, th * W, C_in), lambda b, t: (b, t, 0)),
            w_spec,
            b_spec,
        ],
        out_specs=pl.BlockSpec((1, th, 2, W, 2 * C_out),
                               lambda b, t: (b, t, 0, 0, 0)),
    )

    out5 = pl.pallas_call(
        kernel,
        out_shape=jax.ShapeDtypeStruct((B, H, 2, W, 2 * C_out), out_dtype),
        grid_spec=grid_spec,
        compiler_params=pltpu.CompilerParams(
            dimension_semantics=("parallel", "parallel"),
            vmem_limit_bytes=vmem_limit,
        ),
    )(x, w_mm, b_all)

    # Row-major order of (B, H, 2, W, 2*C_out) is exactly
    # (b, (2i+ki)*2W + (2j+kj), co): the final reshape is free (no transpose).
    return out5.reshape(B, 4 * H * W, C_out)


# -----------------------------------------------------------------------------
# Exact (float64, host-side) ConvTranspose2d k=2 s=2 reference for correctness.
# -----------------------------------------------------------------------------
def upsample_reference_np(x, weight, bias, input_resolution):
    H, W = input_resolution
    x = np.asarray(x, np.float64)
    weight = np.asarray(weight, np.float64)
    bias = np.asarray(bias, np.float64)
    B, L, C_in = x.shape
    C_out = weight.shape[1]
    x_img = x.reshape(B, H, W, C_in)
    # y[b, i, ki, j, kj, co] = sum_ci x[b,i,j,ci] * weight[ci,co,ki,kj]
    y = np.einsum("bijc,copq->bipjqo", x_img, weight) + bias.reshape(1, 1, 1, 1, 1, C_out)
    return y.reshape(B, 4 * H * W, C_out)


if __name__ == "__main__":
    key = jax.random.PRNGKey(0)

    def run_case(B, C_in, C_out, H, W, **kw):
        k1, k2, k3 = jax.random.split(jax.random.fold_in(key, C_out), 3)
        weight = jax.random.normal(k1, (C_in, C_out, 2, 2), jnp.float32) * 0.1  # torch layout
        bias = jax.random.normal(k2, (C_out,), jnp.float32) * 0.1
        x = jax.random.normal(k3, (B, H * W, C_in), jnp.float32)
        out = jax.block_until_ready(upsample_pallas(x, weight, bias, (H, W), **kw))
        assert out.shape == (B, 4 * H * W, C_out), out.shape
        ref = upsample_reference_np(x, weight, bias, (H, W))
        return np.asarray(out.astype(jnp.float32)), ref

    # Split-per-ki path (2*C_out = 32, not a multiple of 128): requested tile + auto tile.
    out, ref = run_case(2, 32, 16, 8, 8, row_tile=4)
    np.testing.assert_allclose(out, ref, rtol=2e-2, atol=2e-2)
    out, ref = run_case(2, 32, 16, 8, 8)
    np.testing.assert_allclose(out, ref, rtol=2e-2, atol=2e-2)

    # Fused-RHS path (2*C_out = 128): the ki lane slice sits on a 128-lane boundary.
    out, ref = run_case(2, 32, 64, 8, 8)
    np.testing.assert_allclose(out, ref, rtol=2e-2, atol=2e-2)

    # bf16 MXU inputs (cast in-register inside the kernel), bf16 writeback, f32 accumulation.
    out, ref = run_case(2, 32, 16, 8, 8, compute_dtype=jnp.bfloat16,
                        out_dtype=jnp.bfloat16)
    np.testing.assert_allclose(out, ref, rtol=5e-2, atol=5e-2)

    print("KERNEL_OK")
</pallas_src>

<mosaic_0001>
module attributes {stable_mosaic.version = 11 : i64} {
  func.func @kernel(%arg0: i32, %arg1: i32, %arg2: memref<1x32x32xf32, #tpu.memory_space<vmem>>, %arg3: memref<2x32x32xf32, #tpu.memory_space<vmem>>, %arg4: memref<1x32xf32, #tpu.memory_space<vmem>>, %arg5: memref<1x4x2x8x32xf32, #tpu.memory_space<vmem>>) attributes {dimension_semantics = [#tpu.dimension_semantics<parallel>, #tpu.dimension_semantics<parallel>], iteration_bounds = array<i64: 2, 2>, scalar_prefetch = 0 : i64, scratch_operands = 0 : i64, tpu.core_type = #tpu.core_type<tc>, window_params = [{transform_indices = @transform_0, window_bounds = array<i64: 1, 32, 32>}, {pipeline_mode = #tpu.pipeline_mode<synchronous>, transform_indices = @transform_1, window_bounds = array<i64: 2, 32, 32>}, {pipeline_mode = #tpu.pipeline_mode<synchronous>, transform_indices = @transform_2, window_bounds = array<i64: 1, 32>}, {transform_indices = @transform_3, window_bounds = array<i64: 1, 4, 2, 8, 32>}]} {
    %c0 = arith.constant 0 : index
    %c0_0 = arith.constant 0 : index
    %c0_1 = arith.constant 0 : index
    %0 = vector.load %arg2[%c0, %c0_0, %c0_1] : memref<1x32x32xf32, #tpu.memory_space<vmem>>, vector<1x32x32xf32>
    %1 = vector.shape_cast %0 : vector<1x32x32xf32> to vector<32x32xf32>
    %c0_2 = arith.constant 0 : index
    %c0_3 = arith.constant 0 : index
    %c0_4 = arith.constant 0 : index
    %2 = vector.load %arg3[%c0_2, %c0_3, %c0_4] : memref<2x32x32xf32, #tpu.memory_space<vmem>>, vector<1x32x32xf32>
    %3 = vector.shape_cast %2 : vector<1x32x32xf32> to vector<32x32xf32>
    %cst = arith.constant dense<0.000000e+00> : vector<32x32xf32>
    %4 = tpu.matmul %1, %3, %cst {dimension_numbers = #tpu.dot_dimension_numbers<[1], [0], [0], [1], [0, 0, 1, 1], [], []>} : vector<32x32xf32>, vector<32x32xf32>, vector<32x32xf32> -> vector<32x32xf32>
    %c0_5 = arith.constant 0 : index
    %c0_6 = arith.constant 0 : index
    %5 = vector.load %arg4[%c0_5, %c0_6] : memref<1x32xf32, #tpu.memory_space<vmem>>, vector<1x32xf32>
    %6 = vector.broadcast %5 : vector<1x32xf32> to vector<32x32xf32>
    %7 = arith.addf %4, %6 : vector<32x32xf32>
    %8 = vector.shape_cast %7 : vector<32x32xf32> to vector<4x8x32xf32>
    %c0_7 = arith.constant 0 : index
    %c0_8 = arith.constant 0 : index
    %c0_9 = arith.constant 0 : index
    %c0_10 = arith.constant 0 : index
    %c0_11 = arith.constant 0 : index
    %9 = vector.load %arg5[%c0_7, %c0_8, %c0_9, %c0_10, %c0_11] : memref<1x4x2x8x32xf32, #tpu.memory_space<vmem>>, vector<1x4x1x8x32xf32>
    %10 = vector.shape_cast %9 : vector<1x4x1x8x32xf32> to vector<4x8x32xf32>
    %11 = vector.shape_cast %8 : vector<4x8x32xf32> to vector<1x4x1x8x32xf32>
    tpu.vector_store %arg5[%c0_7, %c0_8, %c0_9, %c0_10, %c0_11], %11 {strides = array<i32>} : memref<1x4x2x8x32xf32, #tpu.memory_space<vmem>>, vector<1x4x1x8x32xf32>,
    %c1 = arith.constant 1 : index
    %c0_12 = arith.constant 0 : index
    %c0_13 = arith.constant 0 : index
    %12 = vector.load %arg3[%c1, %c0_12, %c0_13] : memref<2x32x32xf32, #tpu.memory_space<vmem>>, vector<1x32x32xf32>
    %13 = vector.shape_cast %12 : vector<1x32x32xf32> to vector<32x32xf32>
    %cst_14 = arith.constant dense<0.000000e+00> : vector<32x32xf32>
    %14 = tpu.matmul %1, %13, %cst_14 {dimension_numbers = #tpu.dot_dimension_numbers<[1], [0], [0], [1], [0, 0, 1, 1], [], []>} : vector<32x32xf32>, vector<32x32xf32>, vector<32x32xf32> -> vector<32x32xf32>
    %c0_15 = arith.constant 0 : index
    %c0_16 = arith.constant 0 : index
    %15 = vector.load %arg4[%c0_15, %c0_16] : memref<1x32xf32, #tpu.memory_space<vmem>>, vector<1x32xf32>
    %16 = vector.broadcast %15 : vector<1x32xf32> to vector<32x32xf32>
    %17 = arith.addf %14, %16 : vector<32x32xf32>
    %18 = vector.shape_cast %17 : vector<32x32xf32> to vector<4x8x32xf32>
    %c0_17 = arith.constant 0 : index
    %c0_18 = arith.constant 0 : index
    %c1_19 = arith.constant 1 : index
    %c0_20 = arith.constant 0 : index
    %c0_21 = arith.constant 0 : index
    %19 = vector.load %arg5[%c0_17, %c0_18, %c1_19, %c0_20, %c0_21] : memref<1x4x2x8x32xf32, #tpu.memory_space<vmem>>, vector<1x4x1x8x32xf32>
    %20 = vector.shape_cast %19 : vector<1x4x1x8x32xf32> to vector<4x8x32xf32>
    %21 = vector.shape_cast %18 : vector<4x8x32xf32> to vector<1x4x1x8x32xf32>
    tpu.vector_store %arg5[%c0_17, %c0_18, %c1_19, %c0_20, %c0_21], %21 {strides = array<i32>} : memref<1x4x2x8x32xf32, #tpu.memory_space<vmem>>, vector<1x4x1x8x32xf32>,
    return
  }
  func.func @transform_0(%arg0: i32, %arg1: i32) -> (i32, i32, i32) {
    %c0_i32 = arith.constant 0 : i32
    %c0_i32_0 = arith.constant 0 : i32
    return %arg0, %arg1, %c0_i32 : i32, i32, i32
  }
  func.func @transform_1(%arg0: i32, %arg1: i32) -> (i32, i32, i32) {
    %c0_i32 = arith.constant 0 : i32
    %c0_i32_0 = arith.constant 0 : i32
    %c0_i32_1 = arith.constant 0 : i32
    %c0_i32_2 = arith.constant 0 : i32
    return %c0_i32, %c0_i32_0, %c0_i32_1 : i32, i32, i32
  }
  func.func @transform_2(%arg0: i32, %arg1: i32) -> (i32, i32) {
    %c0_i32 = arith.constant 0 : i32
    %c0_i32_0 = arith.constant 0 : i32
    %c0_i32_1 = arith.constant 0 : i32
    return %c0_i32, %c0_i32_0 : i32, i32
  }
  func.func @transform_3(%arg0: i32, %arg1: i32) -> (i32, i32, i32, i32, i32) {
    %c0_i32 = arith.constant 0 : i32
    %c0_i32_0 = arith.constant 0 : i32
    %c0_i32_1 = arith.constant 0 : i32
    %c0_i32_2 = arith.constant 0 : i32
    return %arg0, %arg1, %c0_i32, %c0_i32_0, %c0_i32_1 : i32, i32, i32, i32, i32
  }
}

</mosaic_0001>

<bundles_post_ra>
// kernel: tpu_custom_call.1
= control target key start
LH: loop header
LB: loop body
LE: loop exit
PB: predicated region body
PF: predicated region fallthrough
CT: control target
= control target key end

     0   :  { %8 = vsyncpa [#allocation3], 0  ;;  %s991_s0 = inlined_call_operand.vmem [shape: f32[2,64,32], index: 0, kind: input, shape index: {}]   ;;  %s992_s1 = inlined_call_operand.vmem [shape: f32[2,32,32], index: 1, kind: input, shape index: {}]   ;;  %s993_s2 = inlined_call_operand.vmem [shape: f32[1,32], index: 2, kind: input, shape index: {}]   ;;  %s994_s3 = inlined_call_operand.hbm [shape: f32[2,8,2,8,32], index: 3, kind: output, shape index: {}]  }
   0x1   :  { %10 = vsyncpa [#allocation3 + $0x1], 0  ;;  %s805_s12 = smov 0   ;;  %s807_s13 = smov 0  }
   0x2   :  { %s809_s14 = smov 0   ;;  %s811_s15 = smov 0  }
   0x3   :  { %s813_s16 = smov 0   ;;  %s815_s17 = smov 0  }
   0x4   :  { %s817_s18 = smov 0   ;;  %s819_s19 = smov 0  }
   0x5 LB: > { %s518_s20 = sadd.s32 4294967295, %s780_s19   ;;  %s519_s21 = sadd.s32 4294967294, %s780_s19   ;;  %s780_s19 = sphi %s819_s19, %s16_s19   ;;  %s776_s18 = sphi %s817_s18, %s1003_s18   ;;  %s772_s17 = sphi %s815_s17, %s1002_s17   ;;  %s768_s16 = sphi %s813_s16, %s1001_s16   ;;  %s764_s15 = sphi %s811_s15, %s1000_s15   ;;  %s760_s14 = sphi %s809_s14, %s999_s14   ;;  %s756_s13 = sphi %s807_s13, %s998_s13   ;;  %s752_s12 = sphi %s805_s12, %s997_s12  }
   0x6   : > { %s25_s22 = sadd.s32 1, %s772_s17  ;;  %s28_s23 = sadd.s32 1, %s776_s18 }
   0x7   : > { %p26_p0 = scmp.ge.s32.totalorder %s25_s22, 2  ;;  %p117_p1 = scmp.ne.s32.totalorder %s760_s14, %s756_s13 }
   0x8   : > { %p118_p2 = scmp.eq.s32.totalorder %s518_s20, 3  ;;  %p123_p5 = scmp.ne.s32.totalorder %s756_s13, %s752_s12 }
   0x9   : > { %s1005_s22 = smov (%p26_p0, %s25_s22), 0  ;;  %s1007_s23 = smov (!%p26_p0, %s28_s23), %s776_s18 }
   0xa   : > { %s103_s24 = ssub.s32 %s772_s17, %s1005_s22  ;;  %p856_p3 = por %p118_p2, %p117_p1 }
   0xb   : > { %p30_p4 = scmp.ge.s32.totalorder %s1007_s23, 2  ;;  %p124_p6 = scmp.eq.s32.totalorder %s519_s21, 3 }
   0xc   : > { %p522_p7 = scmp.ge.s32.totalorder %s780_s19, 1  ;;  %p161_p9 = scmp.lt.s32.totalorder %s780_s19, 5 }
   0xd   : > { %s1009_s23 = smov (%p30_p4, %s1007_s23), 0  ;;  %p865_p8 = por %p124_p6, %p123_p5 }
   0xe   : > { %s102_s27 = ssub.s32 %s776_s18, %s1009_s23  ;;  %s107_s28 = sadd.s32 1, %s760_s14 }
   0xf   : > { %s104_s29 = sor.u32 %s103_s24, %s102_s27  ;;  %p162_p10 = pnand %p522_p7, %p161_p9 }
  0x10   : > { %p105_p11 = scmp.eq.s32.totalorder %s104_s29, 0  ;;  %v204_v0 = vld [vmem:[%s992_s1] sm:$0xff] (!%p162_p10)  ;;  %v205_v1 = vld [vmem:[%s992_s1 + $0x8] sm:$0xff] (!%p162_p10)  ;;  %s524_s10 = sshll.u32 (!%p162_p10), %s764_s15, 2  ;;  %v206_v5 = vld [vmem:[%s992_s1 + $0x10] sm:$0xff] (!%p162_p10)  ;;  %vm215_vm0 = vcmask (!%p162_p10), 261120  }
  0x11   : > { %165 = sbr.rel (%p162_p10) target bundleno = 266 (0x10a), region = 32  ;;  %v532_v2 = vld [vmem:[%s992_s1 + $0x20] sm:$0xff] (!%p162_p10)  ;;  %p190_p12 = scmp.lt.s32.totalorder (!%p162_p10), %s768_s16, 1  ;;  %v597_v3 = vpack.c.bf16 (!%p162_p10), %v205_v1, %v204_v0  ;;  %v533_v4 = vld [vmem:[%s992_s1 + $0x28] sm:$0xff] (!%p162_p10)  ;;  %v207_v6 = vld [vmem:[%s992_s1 + $0x18] sm:$0xff] (!%p162_p10) }
  0x12   : > { %s874_s30 = scalar_select %p105_p11, %s760_s14, %s107_s28  }
  0x13   : > { %p192_p13 = scmp.lt.s32.totalorder (!%p162_p10), %s524_s10, 7  ;;  %v605_v7 = vpack.c.bf16 (!%p162_p10), %v533_v4, %v532_v2  ;;  %v601_v8 = vpack.c.bf16 (!%p162_p10), %v207_v6, %v206_v5  ;;  %v534_v9 = vld [vmem:[%s992_s1 + $0x30] sm:$0xff] (!%p162_p10)  ;;  %v535_v10 = vld [vmem:[%s992_s1 + $0x38] sm:$0xff] (!%p162_p10)  ;;  %598 = vmatprep.subr.bf16.mxu0 (!%p162_p10), %v597_v3  ;;  %s552_s28 = sshll.u32 (!%p162_p10), %s764_s15, 3  ;;  %v527_v16 = vld [vmem:[%s993_s2] ss:$0 sm:$0xff] (!%p162_p10) }
  0x14   : > { %v609_v11 = vpack.c.bf16 (!%p162_p10), %v535_v10, %v534_v9  ;;  %600 = vmatpush3.bf16.msra.mxu0 (!%p162_p10), %v597_v3  ;;  %s548_s29 = sshll.u32 (!%p162_p10), %s768_s16, 4 }
  0x15   : > { %606 = vmatprep.subr.bf16.mxu1 (!%p162_p10), %v605_v7  ;;  %602 = vmatprep.subr.bf16.mxu0 (!%p162_p10), %v601_v8  ;;  %s433_s6 = sadd.s32 (!%p162_p10), %s552_s28, %s548_s29 }
  0x16   : > { %608 = vmatpush3.bf16.msra.mxu1 (!%p162_p10), %v605_v7 }
  0x17   : > { %610 = vmatprep.subr.bf16.mxu1 (!%p162_p10), %v609_v11 }
  0x18   : > { %s191_s7 = scalar_select %p190_p12, %s768_s16, 1  ;;  %604 = vmatpush3.bf16.msra.mxu0 %v601_v8 }
  0x19   : > { %s1011_s10 = smov (!%p192_p13, %s524_s10), 7 }
  0x1a   : > { %s525_s8 = sshll.u32 %s191_s7, 3  ;;  %612 = vmatpush3.bf16.msra.mxu1 %v609_v11 }
  0x1b   : > { %s195_s9 = sadd.s32 %s525_s8, %s1011_s10  ;;  %s186_s10 = sand.u32 1, %s756_s13  }
  0x1c   : > { %s526_s11 = sshll.u32 %s195_s9, 3  ;;  %s523_s27 = sshll.u32 %s186_s10, 6 }
  0x1d   : > { %s197_s24 = scalar_lea.vmem %s991_s0, %s526_s11  ;;  %s188_s7 = scalar_lea.vmem [#allocation2], %s523_s27 }
  0x1e   : > { %v200_v12 = vld [vmem:[%s197_s24] sm:$0xff]  ;;  %v201_v13 = vld [vmem:[%s197_s24 + $0x8] sm:$0xff]  ;;  %v202_v14 = vld [vmem:[%s197_s24 + $0x10] sm:$0xff]  ;;  %s549_s8 = sshll.u32 %s433_s6, 7  ;;  %s436_s9 = sshll.u32 %s188_s7, 4  ;;  %s931_s9 = int_to_ptr.vmem [resolvable:$true] %s436_s9 }
  0x1f   : > { %577 = vmatprep.mubr.msk.f32.mxu0 %vm215_vm0, %v200_v12  ;;  %591 = vmatprep.mubr.msk.f32.mxu1 %vm215_vm0, %v200_v12  ;;  %v203_v15 = vld [vmem:[%s197_s24 + $0x18] sm:$0xff]  ;;  %s929_s11 = scalar_lea.hbm %s994_s3, %s549_s8  ;;  %s939_s20 = scalar_lea.sflag [#allocation3], %s186_s10 }
  0x20   : > { %578 = vmatmul.mubr.msk.f32.vlgmr.msra.gmra.mrb[0].mxu0 %vm215_vm0, %v201_v13  ;;  %592 = vmatmul.mubr.msk.f32.vlgmr.msra.gmra.mrb[0].mxu1 %vm215_vm0, %v201_v13  ;;  %s686_s21 = scalar_lea.vmem %s931_s9, 1024  ;;  %s782_s24 = smov [#allocation2]  }
  0x21   : > { %580 = vmatprep.mubr.msk.f32.mxu0 %vm215_vm0, %v202_v14  ;;  %594 = vmatprep.mubr.msk.f32.mxu1 %vm215_vm0, %v202_v14  ;;  %p687_p0 = scmp.ne.s32.totalorder %s931_s9, %s686_s21  ;;  %s690_s27 = sshll.u32 %s782_s24, 4  ;;  %s691_s27 = int_to_ptr.vmem [resolvable:$false] %s690_s27 }
  0x22   : > { %s692_s28 = scalar_lea.vmem %s691_s27, 2048  ;;  %p693_p4 = scmp.lt.s32.totalorder %s931_s9, %s691_s27 }
  0x23   : > { %p688_p1 = pnand %p687_p0, %p856_p3  ;;  %p694_p5 = scmp.lt.s32.totalorder %s692_s28, %s686_s21 }
  0x24   : > { %581 = vmatmul.mubr.msk.f32.gmra.mrb[2].mxu0 %vm215_vm0, %v203_v15  ;;  %595 = vmatmul.mubr.msk.f32.gmra.mrb[2].mxu1 %vm215_vm0, %v203_v15 }
  0x25   : > { %p689_p2 = pneg %p688_p1  ;;  %p695_p6 = por %p694_p5, %p693_p4 }
  0x27   : > { %p696_p7 = pnand %p695_p6, %p689_p2 }
  0xf3   : > { %v579_v17 = vpop.f32.mrb[0].mxu0  ;;  %v593_v19 = vpop.f32.mrb[0].mxu1 }
  0xf4   : > { %v300_v18 = vadd.f32 %v579_v17, %v527_v16  ;;  %v294_v20 = vpop.f32.mrb[1].mxu0  ;;  %v401_v21 = vadd.f32 %v593_v19, %v527_v16  ;;  %v395_v23 = vpop.f32.mrb[1].mxu1 }
  0xf5   : > { %v295_v22 = vadd.f32 %v527_v16, %v294_v20  ;;  %v396_v24 = vadd.f32 %v527_v16, %v395_v23 }
  0xf6   : > { %314 = vst.msk [vmem:[%s188_s7 + $0x10] sm:$0xff] %vm215_vm0, %v300_v18  ;;  %542 = vst.msk [vmem:[%s188_s7 + $0x18] sm:$0xff] %vm215_vm0, %v401_v21 }
  0xf7   : > { %313 = vst.msk [vmem:[%s188_s7] sm:$0xff] %vm215_vm0, %v295_v22  ;;  %v582_v25 = vpop.f32.mrb[2].mxu0  ;;  %541 = vst.msk [vmem:[%s188_s7 + $0x8] sm:$0xff] %vm215_vm0, %v396_v24  ;;  %v596_v27 = vpop.f32.mrb[2].mxu1 }
  0xf8   : > { %v310_v26 = vadd.f32 %v582_v25, %v527_v16  ;;  %v304_v28 = vpop.f32.mrb[3].mxu0  ;;  %v411_v29 = vadd.f32 %v596_v27, %v527_v16  ;;  %v405_v31 = vpop.f32.mrb[3].mxu1 }
  0xf9   : > { %v305_v30 = vadd.f32 %v527_v16, %v304_v28  ;;  %v406_v32 = vadd.f32 %v527_v16, %v405_v31 }
  0xfa   : > { %316 = vst.msk [vmem:[%s188_s7 + $0x30] sm:$0xff] %vm215_vm0, %v310_v26  ;;  %544 = vst.msk [vmem:[%s188_s7 + $0x38] sm:$0xff] %vm215_vm0, %v411_v29 }
  0xfb   : > { %315 = vst.msk [vmem:[%s188_s7 + $0x20] sm:$0xff] %vm215_vm0, %v305_v30  ;;  %543 = vst.msk [vmem:[%s188_s7 + $0x28] sm:$0xff] %vm215_vm0, %v406_v32 }
  0xfc   : > { %699 = shalt.err (!%p696_p7)
}
  0xfd   : > { %s700_s10 = scalar_lea.hbm %s929_s11, 1024  ;;  %s704_s5 = scalar_lea.hbm %s994_s3, 4096 }
  0xfe   : > { %p701_p9 = scmp.ne.s32.totalorder %s929_s11, %s700_s10  ;;  %p705_p12 = scmp.lt.u32.totalorder %s929_s11, %s994_s3 }
  0xff   : > { %p706_p13 = scmp.lt.u32.totalorder %s704_s5, %s700_s10  ;;  %p708_p1 = scmp.lt.u32.totalorder %s700_s10, %s929_s11 }
 0x100   : > { %p702_p10 = pnand %p701_p9, %p856_p3 }
 0x101   : > { %p707_p0 = por %p706_p13, %p705_p12 }
 0x102   : > { %p703_p11 = pneg %p702_p10 }
 0x103   : > { %p709_p2 = por %p708_p1, %p707_p0 }
 0x105   : > { %p710_p4 = pnand %p709_p2, %p703_p11 }
 0x107   : > { %713 = shalt.err (!%p710_p4)
}
 0x108   : > { %s783_s8 = smov 128   ;;  %s784_s15 = smov 8  }
 0x109   : > { %613 = dma.vmem_to_hbm [thread:$0]  (%p856_p3), %s931_s9, 1024, %s929_s11, %s939_s20, %s783_s8, %s783_s8, %s784_s15  }
 0x10a PF: > { %p619_p5 = scmp.ge.s32.totalorder %s780_s19, 2  ;;  %s451_s16 = sand.u32 1, %s752_s12  }
 0x10b   : > { %s452_s21 = scalar_lea.sflag [#allocation3], %s451_s16 }
 0x10c   : > { %p616_p6 = pnand %p619_p5, %p865_p8 }
 0x10e   : > { %747 = dma.done.wait (!%p616_p6), %s452_s21, 1024  }
 0x10f   : > { %749 = vsyncadd (!%p616_p6), %s452_s21, 4294966272  ;;  %s16_s19 = sadd.s32 1, %s780_s19   ;;  %s997_s12 = smov %s756_s13 }
 0x110   : > { %p13_p7 = scmp.ge.s32.totalorder %s16_s19, 6   ;;  %s998_s13 = smov %s760_s14 }
 0x111   : > { %s999_s14 = smov %s874_s30  ;;  %s1000_s15 = smov %s772_s17 }
 0x112   : > { %s1001_s16 = smov %s776_s18  ;;  %s1002_s17 = smov %s1005_s22 }
 0x113   : > { %s1003_s18 = smov %s1009_s23  ;;  %15 = sbr.rel (!%p13_p7) target bundleno = 5 (0x5), region = 69 }
 0x11a   :  { %457 = vsyncpa [#allocation3], 1 }
 0x11b   :  { %459 = vsyncpa [#allocation3 + $0x1], 1 }

</bundles_post_ra>
